<compile_context>
chip_gen: v7x
topology: tpu7x:2x2x1
jax: 0.10.0
libtpu: 0.0.40
codegen_flags: <defaults>
</compile_context>

<pallas_src>
import functools

import jax
import jax.numpy as jnp
from jax.experimental import pallas as pl
from jax.experimental.pallas import tpu as pltpu

K = 16            # number of companding intervals (self.K in the module)
DELTA = 1.0 / K   # self.delta

_LANES = 128
_MAX_BLOCK_ROWS = 2048    # 2048 x 128 f32 = 1 MiB per buffer
_ZTABLE_MAX_QP = 23       # use the direct level -> z lookup when Qp <= this

_SMEM_SPEC = pl.BlockSpec(memory_space=pltpu.MemorySpace.SMEM)


# ----------------------------------------------------------------------------
# Pallas kernels
# ----------------------------------------------------------------------------
def _select_chain(x, thr_ref, val_refs, n):
    """Ordered select chain.

    For sorted thresholds thr_ref[0..n-1] (x >= thr_ref[0] assumed), returns,
    for every element of x, val_refs[j][k] with k = max{k : x >= thr_ref[k]}.
    Equivalent to gathering at searchsorted(thr, x, right=True) - 1.
    """
    sels = [jnp.full(x.shape, v[0], x.dtype) for v in val_refs]
    for k in range(1, n):
        m = x >= thr_ref[k]
        sels = [jnp.where(m, v[k], s) for v, s in zip(val_refs, sels)]
    return sels


def _finalize(x, ax, alpha, z):
    # out = sign(x) * alpha * (z if |x| < alpha else 1);  z >= 0 here.
    mag = alpha * jnp.where(ax < alpha, z, 1.0)
    return jnp.where(x < 0.0, -mag, mag)


def _lcq_ztable_kernel(dst_ref, gamma_ref, c1_ref, ztab_ref, scal_ref,
                       x_ref, o_ref, *, s, n_levels):
    """LCQ forward with the expand stage tabulated per quantization level.

    dst/gamma/c1: (K,) f32 SMEM tables (c1 = beta - gamma*dst).
    ztab:         (n_levels,) f32 SMEM table, ztab[r] = expand(r / Qp).
    scal:         (2,) f32 = [alpha, 1/alpha] in SMEM.
    s = Qp (static python float), n_levels = Qp + 1 (static python int).
    """
    alpha = scal_ref[0]
    inv_alpha = scal_ref[1]

    x = x_ref[...]
    ax = jnp.abs(x)
    x_tmp = ax * inv_alpha                              # |x| / alpha

    # compress: y = gamma*(x_tmp - dst) + beta == gamma*x_tmp + c1
    g_sel, c1_sel = _select_chain(x_tmp, dst_ref, (gamma_ref, c1_ref), K)
    y = g_sel * x_tmp + c1_sel

    # round to the quantization grid; r is an integer-valued float >= 0
    r = jnp.round(y * s)

    # expand: z = ztab[min(r, Qp)] via select chain on integer thresholds
    z = jnp.full(x.shape, ztab_ref[0], x.dtype)
    for k in range(1, n_levels):
        z = jnp.where(r >= float(k), ztab_ref[k], z)

    o_ref[...] = _finalize(x, ax, alpha, z)


def _lcq_generic_kernel(dst_ref, gamma_ref, c1_ref, beta_ref, ig_ref, c2_ref,
                        scal_ref, x_ref, o_ref, *, s, inv_s):
    """LCQ forward, generic expand (used when Qp is large).

    ig = 1/gamma, c2 = dst - beta/gamma (precomputed in the wrapper).
    """
    alpha = scal_ref[0]
    inv_alpha = scal_ref[1]

    x = x_ref[...]
    ax = jnp.abs(x)
    x_tmp = ax * inv_alpha

    g_sel, c1_sel = _select_chain(x_tmp, dst_ref, (gamma_ref, c1_ref), K)
    y = g_sel * x_tmp + c1_sel
    y_q = jnp.round(y * s) * inv_s

    # expand: z = (y_q - beta)/gamma + dst == y_q*ig + c2
    ig_sel, c2_sel = _select_chain(y_q, beta_ref, (ig_ref, c2_ref), K)
    z = y_q * ig_sel + c2_sel

    o_ref[...] = _finalize(x, ax, alpha, z)


def _uq_kernel(scal_ref, x_ref, o_ref):
    """_uq.forward (uniform quantizer, used for 2-bit weights)."""
    alpha = scal_ref[0]
    inv_alpha = scal_ref[1]
    x = x_ref[...]
    ax = jnp.abs(x)
    y_q = jnp.round(ax * inv_alpha)
    o_ref[...] = _finalize(x, ax, alpha, y_q)


# ----------------------------------------------------------------------------
# Wrappers (plain-JAX glue: table prep, padding, reshape)
# ----------------------------------------------------------------------------
def _prepare_tables(theta, dst):
    theta_tmp = jax.nn.softmax(theta.astype(jnp.float32), axis=0)
    gamma = theta_tmp / DELTA
    beta = jnp.concatenate(
        [jnp.zeros((1,), jnp.float32), jnp.cumsum(theta_tmp)[: K - 1]]
    )
    dst = dst.astype(jnp.float32)
    c1 = beta - gamma * dst                 # compress: y = gamma*x_tmp + c1
    return dst, gamma, beta, c1


def _pad_lane_dense(x_f32):
    """Flatten to lane-dense (Mp, 128), zero-padded; returns (xf, tm, total)."""
    total = x_f32.size
    flat = x_f32.reshape(-1)
    pad = (-total) % _LANES
    if pad:
        flat = jnp.pad(flat, (0, pad))
    m = flat.shape[0] // _LANES
    xf = flat.reshape(m, _LANES)
    if m <= _MAX_BLOCK_ROWS:
        tm = m                              # single block == full array
    else:
        nblk = -(-m // _MAX_BLOCK_ROWS)     # ceil
        tm = -(-m // nblk)                  # balanced block height
        tm = -(-tm // 8) * 8                # sublane-aligned (8, 128) rule
    pad_rows = (-m) % tm
    if pad_rows:
        xf = jnp.pad(xf, ((0, pad_rows), (0, 0)))
    return xf, tm, total


@functools.partial(jax.jit, static_argnames=("Qp",))
def lcq_forward(x, alpha, theta, dst, *, Qp):
    """LCQ path of LCQ_quantizer.forward (activation / >2-bit weight)."""
    orig_dtype = x.dtype
    x_f32 = x.astype(jnp.float32)

    dst, gamma, beta, c1 = _prepare_tables(theta, dst)
    a = alpha.astype(jnp.float32).reshape(-1)[0]
    scal = jnp.stack([a, 1.0 / a])

    xf, tm, total = _pad_lane_dense(x_f32)
    Mp = xf.shape[0]
    s = float(Qp)

    if Qp <= _ZTABLE_MAX_QP:
        # Tabulate the whole expand stage per quantization level r = 0..Qp:
        # z_table[r] = expand(r/Qp) with the module's exact searchsorted math.
        n_levels = int(Qp) + 1
        yq_levels = jnp.arange(n_levels, dtype=jnp.float32) / s
        idx_q = jnp.searchsorted(beta, yq_levels, side="right") - 1
        ztab = (yq_levels - beta[idx_q]) / gamma[idx_q] + dst[idx_q]
        kernel = functools.partial(_lcq_ztable_kernel, s=s, n_levels=n_levels)
        tables = (dst, gamma, c1, ztab)
    else:
        inv_gamma = 1.0 / gamma
        c2 = dst - beta * inv_gamma         # expand: z = y_q*ig + c2
        kernel = functools.partial(_lcq_generic_kernel, s=s, inv_s=1.0 / s)
        tables = (dst, gamma, c1, beta, inv_gamma, c2)

    x_spec = pl.BlockSpec((tm, _LANES), lambda i: (i, 0))
    out = pl.pallas_call(
        kernel,
        out_shape=jax.ShapeDtypeStruct((Mp, _LANES), jnp.float32),
        grid=(Mp // tm,),
        in_specs=[_SMEM_SPEC] * (len(tables) + 1) + [x_spec],
        out_specs=x_spec,
        compiler_params=pltpu.CompilerParams(
            dimension_semantics=("parallel",)
        ),
    )(*tables, scal, xf)

    out = out.reshape(-1)[:total].reshape(x.shape)
    return out.astype(orig_dtype)


@jax.jit
def uq_forward(x, alpha):
    """Uniform-quantizer path (self.is_weight and bit == 2)."""
    orig_dtype = x.dtype
    x_f32 = x.astype(jnp.float32)
    a = alpha.astype(jnp.float32).reshape(-1)[0]
    scal = jnp.stack([a, 1.0 / a])

    xf, tm, total = _pad_lane_dense(x_f32)
    Mp = xf.shape[0]
    x_spec = pl.BlockSpec((tm, _LANES), lambda i: (i, 0))
    out = pl.pallas_call(
        _uq_kernel,
        out_shape=jax.ShapeDtypeStruct((Mp, _LANES), jnp.float32),
        grid=(Mp // tm,),
        in_specs=[_SMEM_SPEC, x_spec],
        out_specs=x_spec,
        compiler_params=pltpu.CompilerParams(
            dimension_semantics=("parallel",)
        ),
    )(scal, xf)
    out = out.reshape(-1)[:total].reshape(x.shape)
    return out.astype(orig_dtype)


class LCQQuantizer:
    """JAX mirror of LCQ_quantizer (forward only)."""

    def __init__(self, num_bits, mode):
        self.bit = num_bits
        self.K = K
        self.delta = DELTA
        self.is_weight = (mode == "weight")
        if mode == "activation":
            self.Qn = 0
            self.Qp = 2 ** num_bits - 1
        else:  # weight
            self.Qn = 2 ** (num_bits - 1) - 1
            self.Qp = 2 ** (num_bits - 1) - 1
        # parameters (deterministic init; the module inits theta/threshold to
        # 0, but forward asserts alpha > 0, so use a positive threshold here)
        self.threshold = jnp.array([0.8], jnp.float32)
        self.theta = jnp.linspace(-0.4, 0.4, self.K).astype(jnp.float32)
        self.dst = (self.delta * jnp.arange(self.K)).astype(jnp.float32)

    def __call__(self, x):
        if self.is_weight and self.bit == 2:
            return uq_forward(x, self.threshold)
        return lcq_forward(x, self.threshold, self.theta, self.dst, Qp=self.Qp)


# ----------------------------------------------------------------------------
# Pure-JAX reference (mirrors the PyTorch forward; the compress/expand steps
# use the algebraically-identical fused constants of the kernel so the
# comparison against the Pallas output is bit-stable across round()).
# ----------------------------------------------------------------------------
def lcq_reference(x, alpha, theta, dst, Qp):
    dst, gamma, beta, c1 = _prepare_tables(theta, dst)
    inv_gamma = 1.0 / gamma
    c2 = dst - beta * inv_gamma
    a = alpha.astype(jnp.float32).reshape(-1)[0]
    s = float(Qp)
    xf = x.astype(jnp.float32)
    ax = jnp.abs(xf)
    flag_middle = (ax < a).astype(jnp.float32)
    flag_high = 1.0 - flag_middle
    x_tmp = ax * (1.0 / a)
    idx = jnp.searchsorted(dst, x_tmp, side="right") - 1
    y = gamma[idx] * x_tmp + c1[idx]
    y_q = jnp.round(y * s) * (1.0 / s)
    idx_q = jnp.searchsorted(beta, y_q, side="right") - 1
    z = y_q * inv_gamma[idx_q] + c2[idx_q]
    out = jnp.sign(xf) * a * (z * flag_middle + flag_high)
    return out.astype(x.dtype)


if __name__ == "__main__":
    key = jax.random.PRNGKey(0)
    # NCHW activation tensor (small shape)
    x = jax.random.normal(key, (2, 4, 16, 16), dtype=jnp.float32) * 0.7

    # 4-bit activation quantizer (LCQ path, tabulated-expand kernel)
    quant = LCQQuantizer(num_bits=4, mode="activation")
    z = jax.block_until_ready(quant(x))
    z_ref = lcq_reference(x, quant.threshold, quant.theta, quant.dst, quant.Qp)
    assert z.shape == x.shape and z.dtype == x.dtype
    assert jnp.allclose(z, z_ref, atol=1e-5, rtol=1e-5), (
        "4-bit mismatch: max abs diff = "
        f"{float(jnp.max(jnp.abs(z - z_ref)))}"
    )

    # 8-bit activation quantizer (LCQ path, generic beta-chain kernel)
    quant8 = LCQQuantizer(num_bits=8, mode="activation")
    z8 = jax.block_until_ready(quant8(x))
    z8_ref = lcq_reference(x, quant8.threshold, quant8.theta, quant8.dst,
                           quant8.Qp)
    assert jnp.allclose(z8, z8_ref, atol=1e-5, rtol=1e-5), (
        "8-bit mismatch: max abs diff = "
        f"{float(jnp.max(jnp.abs(z8 - z8_ref)))}"
    )

    # 2-bit weight quantizer (_uq path)
    wq = LCQQuantizer(num_bits=2, mode="weight")
    zw = jax.block_until_ready(wq(x))
    a = wq.threshold.reshape(-1)[0]
    fm = (jnp.abs(x) < a).astype(x.dtype)
    zw_ref = jnp.sign(x) * a * (jnp.round(jnp.abs(x) * (1.0 / a)) * fm
                                + (1.0 - fm))
    assert jnp.allclose(zw, zw_ref, atol=1e-5, rtol=1e-5), (
        "uq mismatch: max abs diff = "
        f"{float(jnp.max(jnp.abs(zw - zw_ref)))}"
    )

    print("KERNEL_OK")
</pallas_src>

<mosaic_0001>
module attributes {stable_mosaic.version = 11 : i64} {
  func.func @_lcq_ztable_kernel(%arg0: i32, %arg1: memref<16xf32, #tpu.memory_space<smem>>, %arg2: memref<16xf32, #tpu.memory_space<smem>>, %arg3: memref<16xf32, #tpu.memory_space<smem>>, %arg4: memref<16xf32, #tpu.memory_space<smem>>, %arg5: memref<2xf32, #tpu.memory_space<smem>>, %arg6: memref<16x128xf32, #tpu.memory_space<vmem>>, %arg7: memref<16x128xf32, #tpu.memory_space<vmem>>) attributes {dimension_semantics = [#tpu.dimension_semantics<parallel>], iteration_bounds = array<i64: 1>, scalar_prefetch = 0 : i64, scratch_operands = 0 : i64, tpu.core_type = #tpu.core_type<tc>, window_params = [{transform_indices = @transform_0, window_bounds = array<i64: 16>}, {transform_indices = @transform_1, window_bounds = array<i64: 16>}, {transform_indices = @transform_2, window_bounds = array<i64: 16>}, {transform_indices = @transform_3, window_bounds = array<i64: 16>}, {transform_indices = @transform_4, window_bounds = array<i64: 2>}, {transform_indices = @transform_5, window_bounds = array<i64: 16, 128>}, {transform_indices = @transform_6, window_bounds = array<i64: 16, 128>}]} {
    %c0 = arith.constant 0 : index
    %0 = memref.load %arg5[%c0] : memref<2xf32, #tpu.memory_space<smem>>
    %c1 = arith.constant 1 : index
    %1 = memref.load %arg5[%c1] : memref<2xf32, #tpu.memory_space<smem>>
    %c0_0 = arith.constant 0 : index
    %c0_1 = arith.constant 0 : index
    %2 = vector.load %arg6[%c0_0, %c0_1] : memref<16x128xf32, #tpu.memory_space<vmem>>, vector<16x128xf32>
    %3 = math.absf %2 : vector<16x128xf32>
    %4 = vector.broadcast %1 : f32 to vector<16x128xf32>
    %5 = arith.mulf %3, %4 : vector<16x128xf32>
    %c0_2 = arith.constant 0 : index
    %6 = memref.load %arg2[%c0_2] : memref<16xf32, #tpu.memory_space<smem>>
    %7 = vector.broadcast %6 : f32 to vector<16x128xf32>
    %c0_3 = arith.constant 0 : index
    %8 = memref.load %arg3[%c0_3] : memref<16xf32, #tpu.memory_space<smem>>
    %9 = vector.broadcast %8 : f32 to vector<16x128xf32>
    %c1_4 = arith.constant 1 : index
    %10 = memref.load %arg1[%c1_4] : memref<16xf32, #tpu.memory_space<smem>>
    %11 = vector.broadcast %10 : f32 to vector<16x128xf32>
    %12 = arith.cmpf oge, %5, %11 : vector<16x128xf32>
    %c1_5 = arith.constant 1 : index
    %13 = memref.load %arg2[%c1_5] : memref<16xf32, #tpu.memory_space<smem>>
    %14 = vector.broadcast %13 : f32 to vector<16x128xf32>
    %15 = arith.select %12, %14, %7 : vector<16x128xi1>, vector<16x128xf32>
    %c1_6 = arith.constant 1 : index
    %16 = memref.load %arg3[%c1_6] : memref<16xf32, #tpu.memory_space<smem>>
    %17 = vector.broadcast %16 : f32 to vector<16x128xf32>
    %18 = arith.select %12, %17, %9 : vector<16x128xi1>, vector<16x128xf32>
    %c2 = arith.constant 2 : index
    %19 = memref.load %arg1[%c2] : memref<16xf32, #tpu.memory_space<smem>>
    %20 = vector.broadcast %19 : f32 to vector<16x128xf32>
    %21 = arith.cmpf oge, %5, %20 : vector<16x128xf32>
    %c2_7 = arith.constant 2 : index
    %22 = memref.load %arg2[%c2_7] : memref<16xf32, #tpu.memory_space<smem>>
    %23 = vector.broadcast %22 : f32 to vector<16x128xf32>
    %24 = arith.select %21, %23, %15 : vector<16x128xi1>, vector<16x128xf32>
    %c2_8 = arith.constant 2 : index
    %25 = memref.load %arg3[%c2_8] : memref<16xf32, #tpu.memory_space<smem>>
    %26 = vector.broadcast %25 : f32 to vector<16x128xf32>
    %27 = arith.select %21, %26, %18 : vector<16x128xi1>, vector<16x128xf32>
    %c3 = arith.constant 3 : index
    %28 = memref.load %arg1[%c3] : memref<16xf32, #tpu.memory_space<smem>>
    %29 = vector.broadcast %28 : f32 to vector<16x128xf32>
    %30 = arith.cmpf oge, %5, %29 : vector<16x128xf32>
    %c3_9 = arith.constant 3 : index
    %31 = memref.load %arg2[%c3_9] : memref<16xf32, #tpu.memory_space<smem>>
    %32 = vector.broadcast %31 : f32 to vector<16x128xf32>
    %33 = arith.select %30, %32, %24 : vector<16x128xi1>, vector<16x128xf32>
    %c3_10 = arith.constant 3 : index
    %34 = memref.load %arg3[%c3_10] : memref<16xf32, #tpu.memory_space<smem>>
    %35 = vector.broadcast %34 : f32 to vector<16x128xf32>
    %36 = arith.select %30, %35, %27 : vector<16x128xi1>, vector<16x128xf32>
    %c4 = arith.constant 4 : index
    %37 = memref.load %arg1[%c4] : memref<16xf32, #tpu.memory_space<smem>>
    %38 = vector.broadcast %37 : f32 to vector<16x128xf32>
    %39 = arith.cmpf oge, %5, %38 : vector<16x128xf32>
    %c4_11 = arith.constant 4 : index
    %40 = memref.load %arg2[%c4_11] : memref<16xf32, #tpu.memory_space<smem>>
    %41 = vector.broadcast %40 : f32 to vector<16x128xf32>
    %42 = arith.select %39, %41, %33 : vector<16x128xi1>, vector<16x128xf32>
    %c4_12 = arith.constant 4 : index
    %43 = memref.load %arg3[%c4_12] : memref<16xf32, #tpu.memory_space<smem>>
    %44 = vector.broadcast %43 : f32 to vector<16x128xf32>
    %45 = arith.select %39, %44, %36 : vector<16x128xi1>, vector<16x128xf32>
    %c5 = arith.constant 5 : index
    %46 = memref.load %arg1[%c5] : memref<16xf32, #tpu.memory_space<smem>>
    %47 = vector.broadcast %46 : f32 to vector<16x128xf32>
    %48 = arith.cmpf oge, %5, %47 : vector<16x128xf32>
    %c5_13 = arith.constant 5 : index
    %49 = memref.load %arg2[%c5_13] : memref<16xf32, #tpu.memory_space<smem>>
    %50 = vector.broadcast %49 : f32 to vector<16x128xf32>
    %51 = arith.select %48, %50, %42 : vector<16x128xi1>, vector<16x128xf32>
    %c5_14 = arith.constant 5 : index
    %52 = memref.load %arg3[%c5_14] : memref<16xf32, #tpu.memory_space<smem>>
    %53 = vector.broadcast %52 : f32 to vector<16x128xf32>
    %54 = arith.select %48, %53, %45 : vector<16x128xi1>, vector<16x128xf32>
    %c6 = arith.constant 6 : index
    %55 = memref.load %arg1[%c6] : memref<16xf32, #tpu.memory_space<smem>>
    %56 = vector.broadcast %55 : f32 to vector<16x128xf32>
    %57 = arith.cmpf oge, %5, %56 : vector<16x128xf32>
    %c6_15 = arith.constant 6 : index
    %58 = memref.load %arg2[%c6_15] : memref<16xf32, #tpu.memory_space<smem>>
    %59 = vector.broadcast %58 : f32 to vector<16x128xf32>
    %60 = arith.select %57, %59, %51 : vector<16x128xi1>, vector<16x128xf32>
    %c6_16 = arith.constant 6 : index
    %61 = memref.load %arg3[%c6_16] : memref<16xf32, #tpu.memory_space<smem>>
    %62 = vector.broadcast %61 : f32 to vector<16x128xf32>
    %63 = arith.select %57, %62, %54 : vector<16x128xi1>, vector<16x128xf32>
    %c7 = arith.constant 7 : index
    %64 = memref.load %arg1[%c7] : memref<16xf32, #tpu.memory_space<smem>>
    %65 = vector.broadcast %64 : f32 to vector<16x128xf32>
    %66 = arith.cmpf oge, %5, %65 : vector<16x128xf32>
    %c7_17 = arith.constant 7 : index
    %67 = memref.load %arg2[%c7_17] : memref<16xf32, #tpu.memory_space<smem>>
    %68 = vector.broadcast %67 : f32 to vector<16x128xf32>
    %69 = arith.select %66, %68, %60 : vector<16x128xi1>, vector<16x128xf32>
    %c7_18 = arith.constant 7 : index
    %70 = memref.load %arg3[%c7_18] : memref<16xf32, #tpu.memory_space<smem>>
    %71 = vector.broadcast %70 : f32 to vector<16x128xf32>
    %72 = arith.select %66, %71, %63 : vector<16x128xi1>, vector<16x128xf32>
    %c8 = arith.constant 8 : index
    %73 = memref.load %arg1[%c8] : memref<16xf32, #tpu.memory_space<smem>>
    %74 = vector.broadcast %73 : f32 to vector<16x128xf32>
    %75 = arith.cmpf oge, %5, %74 : vector<16x128xf32>
    %c8_19 = arith.constant 8 : index
    %76 = memref.load %arg2[%c8_19] : memref<16xf32, #tpu.memory_space<smem>>
    %77 = vector.broadcast %76 : f32 to vector<16x128xf32>
    %78 = arith.select %75, %77, %69 : vector<16x128xi1>, vector<16x128xf32>
    %c8_20 = arith.constant 8 : index
    %79 = memref.load %arg3[%c8_20] : memref<16xf32, #tpu.memory_space<smem>>
    %80 = vector.broadcast %79 : f32 to vector<16x128xf32>
    %81 = arith.select %75, %80, %72 : vector<16x128xi1>, vector<16x128xf32>
    %c9 = arith.constant 9 : index
    %82 = memref.load %arg1[%c9] : memref<16xf32, #tpu.memory_space<smem>>
    %83 = vector.broadcast %82 : f32 to vector<16x128xf32>
    %84 = arith.cmpf oge, %5, %83 : vector<16x128xf32>
    %c9_21 = arith.constant 9 : index
    %85 = memref.load %arg2[%c9_21] : memref<16xf32, #tpu.memory_space<smem>>
    %86 = vector.broadcast %85 : f32 to vector<16x128xf32>
    %87 = arith.select %84, %86, %78 : vector<16x128xi1>, vector<16x128xf32>
    %c9_22 = arith.constant 9 : index
    %88 = memref.load %arg3[%c9_22] : memref<16xf32, #tpu.memory_space<smem>>
    %89 = vector.broadcast %88 : f32 to vector<16x128xf32>
    %90 = arith.select %84, %89, %81 : vector<16x128xi1>, vector<16x128xf32>
    %c10 = arith.constant 10 : index
    %91 = memref.load %arg1[%c10] : memref<16xf32, #tpu.memory_space<smem>>
    %92 = vector.broadcast %91 : f32 to vector<16x128xf32>
    %93 = arith.cmpf oge, %5, %92 : vector<16x128xf32>
    %c10_23 = arith.constant 10 : index
    %94 = memref.load %arg2[%c10_23] : memref<16xf32, #tpu.memory_space<smem>>
    %95 = vector.broadcast %94 : f32 to vector<16x128xf32>
    %96 = arith.select %93, %95, %87 : vector<16x128xi1>, vector<16x128xf32>
    %c10_24 = arith.constant 10 : index
    %97 = memref.load %arg3[%c10_24] : memref<16xf32, #tpu.memory_space<smem>>
    %98 = vector.broadcast %97 : f32 to vector<16x128xf32>
    %99 = arith.select %93, %98, %90 : vector<16x128xi1>, vector<16x128xf32>
    %c11 = arith.constant 11 : index
    %100 = memref.load %arg1[%c11] : memref<16xf32, #tpu.memory_space<smem>>
    %101 = vector.broadcast %100 : f32 to vector<16x128xf32>
    %102 = arith.cmpf oge, %5, %101 : vector<16x128xf32>
    %c11_25 = arith.constant 11 : index
    %103 = memref.load %arg2[%c11_25] : memref<16xf32, #tpu.memory_space<smem>>
    %104 = vector.broadcast %103 : f32 to vector<16x128xf32>
    %105 = arith.select %102, %104, %96 : vector<16x128xi1>, vector<16x128xf32>
    %c11_26 = arith.constant 11 : index
    %106 = memref.load %arg3[%c11_26] : memref<16xf32, #tpu.memory_space<smem>>
    %107 = vector.broadcast %106 : f32 to vector<16x128xf32>
    %108 = arith.select %102, %107, %99 : vector<16x128xi1>, vector<16x128xf32>
    %c12 = arith.constant 12 : index
    %109 = memref.load %arg1[%c12] : memref<16xf32, #tpu.memory_space<smem>>
    %110 = vector.broadcast %109 : f32 to vector<16x128xf32>
    %111 = arith.cmpf oge, %5, %110 : vector<16x128xf32>
    %c12_27 = arith.constant 12 : index
    %112 = memref.load %arg2[%c12_27] : memref<16xf32, #tpu.memory_space<smem>>
    %113 = vector.broadcast %112 : f32 to vector<16x128xf32>
    %114 = arith.select %111, %113, %105 : vector<16x128xi1>, vector<16x128xf32>
    %c12_28 = arith.constant 12 : index
    %115 = memref.load %arg3[%c12_28] : memref<16xf32, #tpu.memory_space<smem>>
    %116 = vector.broadcast %115 : f32 to vector<16x128xf32>
    %117 = arith.select %111, %116, %108 : vector<16x128xi1>, vector<16x128xf32>
    %c13 = arith.constant 13 : index
    %118 = memref.load %arg1[%c13] : memref<16xf32, #tpu.memory_space<smem>>
    %119 = vector.broadcast %118 : f32 to vector<16x128xf32>
    %120 = arith.cmpf oge, %5, %119 : vector<16x128xf32>
    %c13_29 = arith.constant 13 : index
    %121 = memref.load %arg2[%c13_29] : memref<16xf32, #tpu.memory_space<smem>>
    %122 = vector.broadcast %121 : f32 to vector<16x128xf32>
    %123 = arith.select %120, %122, %114 : vector<16x128xi1>, vector<16x128xf32>
    %c13_30 = arith.constant 13 : index
    %124 = memref.load %arg3[%c13_30] : memref<16xf32, #tpu.memory_space<smem>>
    %125 = vector.broadcast %124 : f32 to vector<16x128xf32>
    %126 = arith.select %120, %125, %117 : vector<16x128xi1>, vector<16x128xf32>
    %c14 = arith.constant 14 : index
    %127 = memref.load %arg1[%c14] : memref<16xf32, #tpu.memory_space<smem>>
    %128 = vector.broadcast %127 : f32 to vector<16x128xf32>
    %129 = arith.cmpf oge, %5, %128 : vector<16x128xf32>
    %c14_31 = arith.constant 14 : index
    %130 = memref.load %arg2[%c14_31] : memref<16xf32, #tpu.memory_space<smem>>
    %131 = vector.broadcast %130 : f32 to vector<16x128xf32>
    %132 = arith.select %129, %131, %123 : vector<16x128xi1>, vector<16x128xf32>
    %c14_32 = arith.constant 14 : index
    %133 = memref.load %arg3[%c14_32] : memref<16xf32, #tpu.memory_space<smem>>
    %134 = vector.broadcast %133 : f32 to vector<16x128xf32>
    %135 = arith.select %129, %134, %126 : vector<16x128xi1>, vector<16x128xf32>
    %c15 = arith.constant 15 : index
    %136 = memref.load %arg1[%c15] : memref<16xf32, #tpu.memory_space<smem>>
    %137 = vector.broadcast %136 : f32 to vector<16x128xf32>
    %138 = arith.cmpf oge, %5, %137 : vector<16x128xf32>
    %c15_33 = arith.constant 15 : index
    %139 = memref.load %arg2[%c15_33] : memref<16xf32, #tpu.memory_space<smem>>
    %140 = vector.broadcast %139 : f32 to vector<16x128xf32>
    %141 = arith.select %138, %140, %132 : vector<16x128xi1>, vector<16x128xf32>
    %c15_34 = arith.constant 15 : index
    %142 = memref.load %arg3[%c15_34] : memref<16xf32, #tpu.memory_space<smem>>
    %143 = vector.broadcast %142 : f32 to vector<16x128xf32>
    %144 = arith.select %138, %143, %135 : vector<16x128xi1>, vector<16x128xf32>
    %145 = arith.mulf %141, %5 : vector<16x128xf32>
    %146 = arith.addf %145, %144 : vector<16x128xf32>
    %cst = arith.constant 1.500000e+01 : f32
    %147 = vector.broadcast %cst : f32 to vector<16x128xf32>
    %148 = arith.mulf %146, %147 : vector<16x128xf32>
    %149 = math.roundeven %148 : vector<16x128xf32>
    %c0_35 = arith.constant 0 : index
    %150 = memref.load %arg4[%c0_35] : memref<16xf32, #tpu.memory_space<smem>>
    %151 = vector.broadcast %150 : f32 to vector<16x128xf32>
    %cst_36 = arith.constant 1.000000e+00 : f32
    %152 = vector.broadcast %cst_36 : f32 to vector<16x128xf32>
    %153 = arith.cmpf oge, %149, %152 : vector<16x128xf32>
    %c1_37 = arith.constant 1 : index
    %154 = memref.load %arg4[%c1_37] : memref<16xf32, #tpu.memory_space<smem>>
    %155 = vector.broadcast %154 : f32 to vector<16x128xf32>
    %156 = arith.select %153, %155, %151 : vector<16x128xi1>, vector<16x128xf32>
    %cst_38 = arith.constant 2.000000e+00 : f32
    %157 = vector.broadcast %cst_38 : f32 to vector<16x128xf32>
    %158 = arith.cmpf oge, %149, %157 : vector<16x128xf32>
    %c2_39 = arith.constant 2 : index
    %159 = memref.load %arg4[%c2_39] : memref<16xf32, #tpu.memory_space<smem>>
    %160 = vector.broadcast %159 : f32 to vector<16x128xf32>
    %161 = arith.select %158, %160, %156 : vector<16x128xi1>, vector<16x128xf32>
    %cst_40 = arith.constant 3.000000e+00 : f32
    %162 = vector.broadcast %cst_40 : f32 to vector<16x128xf32>
    %163 = arith.cmpf oge, %149, %162 : vector<16x128xf32>
    %c3_41 = arith.constant 3 : index
    %164 = memref.load %arg4[%c3_41] : memref<16xf32, #tpu.memory_space<smem>>
    %165 = vector.broadcast %164 : f32 to vector<16x128xf32>
    %166 = arith.select %163, %165, %161 : vector<16x128xi1>, vector<16x128xf32>
    %cst_42 = arith.constant 4.000000e+00 : f32
    %167 = vector.broadcast %cst_42 : f32 to vector<16x128xf32>
    %168 = arith.cmpf oge, %149, %167 : vector<16x128xf32>
    %c4_43 = arith.constant 4 : index
    %169 = memref.load %arg4[%c4_43] : memref<16xf32, #tpu.memory_space<smem>>
    %170 = vector.broadcast %169 : f32 to vector<16x128xf32>
    %171 = arith.select %168, %170, %166 : vector<16x128xi1>, vector<16x128xf32>
    %cst_44 = arith.constant 5.000000e+00 : f32
    %172 = vector.broadcast %cst_44 : f32 to vector<16x128xf32>
    %173 = arith.cmpf oge, %149, %172 : vector<16x128xf32>
    %c5_45 = arith.constant 5 : index
    %174 = memref.load %arg4[%c5_45] : memref<16xf32, #tpu.memory_space<smem>>
    %175 = vector.broadcast %174 : f32 to vector<16x128xf32>
    %176 = arith.select %173, %175, %171 : vector<16x128xi1>, vector<16x128xf32>
    %cst_46 = arith.constant 6.000000e+00 : f32
    %177 = vector.broadcast %cst_46 : f32 to vector<16x128xf32>
    %178 = arith.cmpf oge, %149, %177 : vector<16x128xf32>
    %c6_47 = arith.constant 6 : index
    %179 = memref.load %arg4[%c6_47] : memref<16xf32, #tpu.memory_space<smem>>
    %180 = vector.broadcast %179 : f32 to vector<16x128xf32>
    %181 = arith.select %178, %180, %176 : vector<16x128xi1>, vector<16x128xf32>
    %cst_48 = arith.constant 7.000000e+00 : f32
    %182 = vector.broadcast %cst_48 : f32 to vector<16x128xf32>
    %183 = arith.cmpf oge, %149, %182 : vector<16x128xf32>
    %c7_49 = arith.constant 7 : index
    %184 = memref.load %arg4[%c7_49] : memref<16xf32, #tpu.memory_space<smem>>
    %185 = vector.broadcast %184 : f32 to vector<16x128xf32>
    %186 = arith.select %183, %185, %181 : vector<16x128xi1>, vector<16x128xf32>
    %cst_50 = arith.constant 8.000000e+00 : f32
    %187 = vector.broadcast %cst_50 : f32 to vector<16x128xf32>
    %188 = arith.cmpf oge, %149, %187 : vector<16x128xf32>
    %c8_51 = arith.constant 8 : index
    %189 = memref.load %arg4[%c8_51] : memref<16xf32, #tpu.memory_space<smem>>
    %190 = vector.broadcast %189 : f32 to vector<16x128xf32>
    %191 = arith.select %188, %190, %186 : vector<16x128xi1>, vector<16x128xf32>
    %cst_52 = arith.constant 9.000000e+00 : f32
    %192 = vector.broadcast %cst_52 : f32 to vector<16x128xf32>
    %193 = arith.cmpf oge, %149, %192 : vector<16x128xf32>
    %c9_53 = arith.constant 9 : index
    %194 = memref.load %arg4[%c9_53] : memref<16xf32, #tpu.memory_space<smem>>
    %195 = vector.broadcast %194 : f32 to vector<16x128xf32>
    %196 = arith.select %193, %195, %191 : vector<16x128xi1>, vector<16x128xf32>
    %cst_54 = arith.constant 1.000000e+01 : f32
    %197 = vector.broadcast %cst_54 : f32 to vector<16x128xf32>
    %198 = arith.cmpf oge, %149, %197 : vector<16x128xf32>
    %c10_55 = arith.constant 10 : index
    %199 = memref.load %arg4[%c10_55] : memref<16xf32, #tpu.memory_space<smem>>
    %200 = vector.broadcast %199 : f32 to vector<16x128xf32>
    %201 = arith.select %198, %200, %196 : vector<16x128xi1>, vector<16x128xf32>
    %cst_56 = arith.constant 1.100000e+01 : f32
    %202 = vector.broadcast %cst_56 : f32 to vector<16x128xf32>
    %203 = arith.cmpf oge, %149, %202 : vector<16x128xf32>
    %c11_57 = arith.constant 11 : index
    %204 = memref.load %arg4[%c11_57] : memref<16xf32, #tpu.memory_space<smem>>
    %205 = vector.broadcast %204 : f32 to vector<16x128xf32>
    %206 = arith.select %203, %205, %201 : vector<16x128xi1>, vector<16x128xf32>
    %cst_58 = arith.constant 1.200000e+01 : f32
    %207 = vector.broadcast %cst_58 : f32 to vector<16x128xf32>
    %208 = arith.cmpf oge, %149, %207 : vector<16x128xf32>
    %c12_59 = arith.constant 12 : index
    %209 = memref.load %arg4[%c12_59] : memref<16xf32, #tpu.memory_space<smem>>
    %210 = vector.broadcast %209 : f32 to vector<16x128xf32>
    %211 = arith.select %208, %210, %206 : vector<16x128xi1>, vector<16x128xf32>
    %cst_60 = arith.constant 1.300000e+01 : f32
    %212 = vector.broadcast %cst_60 : f32 to vector<16x128xf32>
    %213 = arith.cmpf oge, %149, %212 : vector<16x128xf32>
    %c13_61 = arith.constant 13 : index
    %214 = memref.load %arg4[%c13_61] : memref<16xf32, #tpu.memory_space<smem>>
    %215 = vector.broadcast %214 : f32 to vector<16x128xf32>
    %216 = arith.select %213, %215, %211 : vector<16x128xi1>, vector<16x128xf32>
    %cst_62 = arith.constant 1.400000e+01 : f32
    %217 = vector.broadcast %cst_62 : f32 to vector<16x128xf32>
    %218 = arith.cmpf oge, %149, %217 : vector<16x128xf32>
    %c14_63 = arith.constant 14 : index
    %219 = memref.load %arg4[%c14_63] : memref<16xf32, #tpu.memory_space<smem>>
    %220 = vector.broadcast %219 : f32 to vector<16x128xf32>
    %221 = arith.select %218, %220, %216 : vector<16x128xi1>, vector<16x128xf32>
    %cst_64 = arith.constant 1.500000e+01 : f32
    %222 = vector.broadcast %cst_64 : f32 to vector<16x128xf32>
    %223 = arith.cmpf oge, %149, %222 : vector<16x128xf32>
    %c15_65 = arith.constant 15 : index
    %224 = memref.load %arg4[%c15_65] : memref<16xf32, #tpu.memory_space<smem>>
    %225 = vector.broadcast %224 : f32 to vector<16x128xf32>
    %226 = arith.select %223, %225, %221 : vector<16x128xi1>, vector<16x128xf32>
    %227 = vector.broadcast %0 : f32 to vector<16x128xf32>
    %228 = arith.cmpf olt, %3, %227 : vector<16x128xf32>
    %cst_66 = arith.constant 1.000000e+00 : f32
    %229 = vector.broadcast %cst_66 : f32 to vector<16x128xf32>
    %230 = arith.select %228, %226, %229 : vector<16x128xi1>, vector<16x128xf32>
    %231 = vector.broadcast %0 : f32 to vector<16x128xf32>
    %232 = arith.mulf %231, %230 : vector<16x128xf32>
    %cst_67 = arith.constant 0.000000e+00 : f32
    %233 = vector.broadcast %cst_67 : f32 to vector<16x128xf32>
    %234 = arith.cmpf olt, %2, %233 : vector<16x128xf32>
    %cst_68 = arith.constant 0.000000e+00 : f32
    %235 = vector.broadcast %cst_68 : f32 to vector<16x128xf32>
    %236 = arith.subf %235, %232 : vector<16x128xf32>
    %237 = arith.select %234, %236, %232 : vector<16x128xi1>, vector<16x128xf32>
    %c0_69 = arith.constant 0 : index
    %c0_70 = arith.constant 0 : index
    %238 = vector.load %arg7[%c0_69, %c0_70] : memref<16x128xf32, #tpu.memory_space<vmem>>, vector<16x128xf32>
    tpu.vector_store %arg7[%c0_69, %c0_70], %237 {strides = array<i32>} : memref<16x128xf32, #tpu.memory_space<vmem>>, vector<16x128xf32>,
    return
  }
  func.func @transform_0(%arg0: i32) -> i32 {
    %c0_i32 = arith.constant 0 : i32
    %c0_i32_0 = arith.constant 0 : i32
    return %c0_i32 : i32
  }
  func.func @transform_1(%arg0: i32) -> i32 {
    %c0_i32 = arith.constant 0 : i32
    %c0_i32_0 = arith.constant 0 : i32
    return %c0_i32 : i32
  }
  func.func @transform_2(%arg0: i32) -> i32 {
    %c0_i32 = arith.constant 0 : i32
    %c0_i32_0 = arith.constant 0 : i32
    return %c0_i32 : i32
  }
  func.func @transform_3(%arg0: i32) -> i32 {
    %c0_i32 = arith.constant 0 : i32
    %c0_i32_0 = arith.constant 0 : i32
    return %c0_i32 : i32
  }
  func.func @transform_4(%arg0: i32) -> i32 {
    %c0_i32 = arith.constant 0 : i32
    %c0_i32_0 = arith.constant 0 : i32
    return %c0_i32 : i32
  }
  func.func @transform_5(%arg0: i32) -> (i32, i32) {
    %c0_i32 = arith.constant 0 : i32
    %c0_i32_0 = arith.constant 0 : i32
    return %arg0, %c0_i32 : i32, i32
  }
  func.func @transform_6(%arg0: i32) -> (i32, i32) {
    %c0_i32 = arith.constant 0 : i32
    %c0_i32_0 = arith.constant 0 : i32
    return %arg0, %c0_i32 : i32, i32
  }
}

</mosaic_0001>

<bundles_post_ra>
// kernel: custom-call.1
= control target key start
LH: loop header
LB: loop body
LE: loop exit
PB: predicated region body
PF: predicated region fallthrough
CT: control target
= control target key end

     0   :  { %s6_s0 = inlined_call_operand.vmem [shape: u32[16], index: 0, kind: output, shape index: {}]  }

// kernel: lcq_forward.1
= control target key start
LH: loop header
LB: loop body
LE: loop exit
PB: predicated region body
PF: predicated region fallthrough
CT: control target
= control target key end

     0   :  { %11 = vsyncpa [#allocation3], 0  ;;  %s931_s0 = inlined_call_operand.vmem [shape: f32[16], index: 0, kind: input, shape index: {}]   ;;  %s932_s1 = inlined_call_operand.vmem [shape: f32[16], index: 1, kind: input, shape index: {}]   ;;  %s933_s2 = inlined_call_operand.vmem [shape: f32[16], index: 2, kind: input, shape index: {}]   ;;  %s934_s3 = inlined_call_operand.vmem [shape: f32[16], index: 3, kind: input, shape index: {}]   ;;  %s935_s4 = inlined_call_operand.vmem [shape: f32[2], index: 4, kind: input, shape index: {}]   ;;  %s936_s5 = inlined_call_operand.vmem [shape: f32[16,128], index: 5, kind: input, shape index: {}]   ;;  %s937_s6 = inlined_call_operand.vmem [shape: f32[16,128], index: 6, kind: output, shape index: {}]  }
   0x1   :  { %12 = vsyncpa [#allocation5], 0  ;;  %s30_s23 = sshll.u32 %s932_s1, 4  ;;  %s31_s23 = int_to_ptr.vmem [resolvable:$true] %s30_s23 }
   0x2   :  { %13 = vsyncpa [#allocation8], 0  ;;  %s50_s26 = sshll.u32 %s934_s3, 4  ;;  %s465_s27 = scalar_lea.vmem %s31_s23, 16  ;;  %s51_s26 = int_to_ptr.vmem [resolvable:$true] %s50_s26 }
   0x3   :  { %p466_p0 = scmp.ne.s32.totalorder %s31_s23, %s465_s27  ;;  %p470_p1 = scmp.lt.s32.totalorder %s31_s23, %s31_s23 }
   0x4   :  { %p471_p2 = scmp.lt.s32.totalorder %s465_s27, %s465_s27 }
   0x6   :  { %p472_p3 = por %p471_p2, %p470_p1 }
   0x8   :  { %p473_p4 = pnand %p472_p3, %p466_p0 }
   0xa   :  { %476 = shalt.err (!%p473_p4)
}
   0xb   :  { %s531_s28 = smov [#allocation4]   ;;  %s477_s29 = scalar_lea.vmem %s51_s26, 16 }
   0xc   :  { %33 = dma.vmem_to_smem %s31_s23, 16, %s531_s28, [#allocation5]  }
   0xd   :  { %p478_p5 = scmp.ne.s32.totalorder %s51_s26, %s477_s29  ;;  %p482_p6 = scmp.lt.s32.totalorder %s51_s26, %s51_s26 }
   0xe   :  { %p483_p7 = scmp.lt.s32.totalorder %s477_s29, %s477_s29 }
  0x10   :  { %p484_p8 = por %p483_p7, %p482_p6 }
  0x12   :  { %p485_p9 = pnand %p484_p8, %p478_p5 }
  0x14   :  { %488 = shalt.err (!%p485_p9)
}
  0x15   :  { %s532_s1 = smov [#allocation7]   ;;  %s20_s7 = sshll.u32 %s931_s0, 4  ;;  %s21_s7 = int_to_ptr.vmem [resolvable:$true] %s20_s7 }
  0x16   :  { %53 = dma.vmem_to_smem %s51_s26, 16, %s532_s1, [#allocation8]  }
  0x17   :  { %s40_s10 = sshll.u32 %s933_s2, 4  ;;  %s489_s11 = scalar_lea.vmem %s21_s7, 16  ;;  %s41_s10 = int_to_ptr.vmem [resolvable:$true] %s40_s10 }
  0x18   :  { %p490_p10 = scmp.ne.s32.totalorder %s21_s7, %s489_s11  ;;  %p494_p11 = scmp.lt.s32.totalorder %s21_s7, %s21_s7 }
  0x19   :  { %p495_p12 = scmp.lt.s32.totalorder %s489_s11, %s489_s11 }
  0x1b   :  { %p496_p13 = por %p495_p12, %p494_p11 }
  0x1d   :  { %p497_p0 = pnand %p496_p13, %p490_p10 }
  0x1f   :  { %500 = shalt.err (!%p497_p0)
}
  0x20   :  { %s533_s12 = smov [#allocation2]   ;;  %s501_s13 = scalar_lea.vmem %s41_s10, 16 }
  0x21   :  { %23 = dma.vmem_to_smem %s21_s7, 16, %s533_s12, [#allocation3]  }
  0x22   :  { %p502_p1 = scmp.ne.s32.totalorder %s41_s10, %s501_s13  ;;  %p506_p2 = scmp.lt.s32.totalorder %s41_s10, %s41_s10 }
  0x23   :  { %p507_p3 = scmp.lt.s32.totalorder %s501_s13, %s501_s13 }
  0x25   :  { %p508_p4 = por %p507_p3, %p506_p2 }
  0x27   :  { %p509_p5 = pnand %p508_p4, %p502_p1 }
  0x29   :  { %512 = shalt.err (!%p509_p5)
}
  0x2a   :  { %s534_s0 = smov [#allocation6]   ;;  %s60_s15 = sshll.u32 %s935_s4, 4  ;;  %s61_s15 = int_to_ptr.vmem [resolvable:$true] %s60_s15 }
  0x2b   :  { %43 = dma.vmem_to_smem %s41_s10, 16, %s534_s0, [#allocation5]  }
  0x2c   :  { %s513_s16 = scalar_lea.vmem %s61_s15, 16  ;;  %p518_p7 = scmp.lt.s32.totalorder %s61_s15, %s61_s15 }
  0x2d   :  { %p514_p6 = scmp.ne.s32.totalorder %s61_s15, %s513_s16  ;;  %p519_p8 = scmp.lt.s32.totalorder %s513_s16, %s513_s16 }
  0x2f   :  { %p520_p9 = por %p519_p8, %p518_p7 }
  0x31   :  { %p521_p10 = pnand %p520_p9, %p514_p6 }
  0x33   :  { %524 = shalt.err (!%p521_p10)
}
  0x34   :  { %s535_s17 = smov [#allocation9]  }
  0x35   :  { %63 = dma.vmem_to_smem %s61_s15, 16, %s535_s17, [#allocation8]  }
  0x36   :  { %525 = dma.done.wait [#allocation3], 16  }
  0x37   :  { %526 = vsyncadd [#allocation3], 4294967280 }
  0x38   :  { %527 = dma.done.wait [#allocation5], 32  }
  0x39   :  { %528 = vsyncadd [#allocation5], 4294967264 }
  0x3a   :  { %529 = dma.done.wait [#allocation8], 32  }
  0x3b   :  { %530 = vsyncadd [#allocation8], 4294967264 }
  0x3c   :  { %81 = sfence }
  0x3d   :  { %s397_s18 = sld [smem:[#allocation9 + $0x1]]  ;;  %v589_v0 = vld [vmem:[%s936_s5] sm:$0xff]  ;;  %v594_v1 = vld [vmem:[%s936_s5 + $0x8] sm:$0xff]  ;;  %s91_s22 = sld [smem:[#allocation4]] }
  0x3e   :  { %v86_v2 = vand.u32 2147483647, %v589_v0  ;;  %s93_s23 = sld [smem:[#allocation6]]  ;;  %s398_s24 = sld [smem:[#allocation2 + $0x1]]  ;;  %v87_v3 = vand.u32 2147483647, %v594_v1 }
  0x3f   :  { %s399_s25 = sld [smem:[#allocation4 + $0x1]]  ;;  %s598_s27 = sld [smem:[#allocation2 + $0x2]] }
  0x40   :  { %s400_s26 = sld [smem:[#allocation6 + $0x1]]  ;;  %s600_s28 = sld [smem:[#allocation4 + $0x2]] }
  0x41   :  { %s602_s29 = sld [smem:[#allocation6 + $0x2]]  ;;  %s604_s1 = sld [smem:[#allocation2 + $0x3]] }
  0x42   :  { %s606_s5 = sld [smem:[#allocation4 + $0x3]]  ;;  %s618_s30 = sld [smem:[#allocation2 + $0x4]] }
  0x43   :  { %v88_v4 = vstv %s397_s18  ;;  %s608_s3 = sld [smem:[#allocation6 + $0x3]]  ;;  %v92_v7 = vstv %s91_s22  ;;  %s620_s7 = sld [smem:[#allocation4 + $0x4]] }
  0x44   :  { %v612_v5 = vmul.f32 %v88_v4, %v86_v2  ;;  %v616_v6 = vmul.f32 %v88_v4, %v87_v3  ;;  %v94_v8 = vstv %s93_s23  ;;  %v96_v9 = vstv %s398_s24  ;;  %s622_s8 = sld [smem:[#allocation6 + $0x4]]  ;;  %s624_s9 = sld [smem:[#allocation2 + $0x5]] }
  0x45   :  { %v100_v10 = vstv %s399_s25  ;;  %s628_s10 = sld [smem:[#allocation4 + $0x5]]  ;;  %v108_v16 = vstv %s598_s27  ;;  %s636_s12 = sld [smem:[#allocation2 + $0x6]] }
  0x46   :  { %vm97_vm0 = vcmp.ge.f32.partialorder %v612_v5, %v96_v9  ;;  %vm98_vm1 = vcmp.ge.f32.partialorder %v616_v6, %v96_v9  ;;  %v104_v11 = vstv %s400_s26  ;;  %s630_s11 = sld [smem:[#allocation6 + $0x5]]  ;;  %v112_v17 = vstv %s600_s28  ;;  %s638_s13 = sld [smem:[#allocation4 + $0x6]] }
  0x47   :  { %v101_v12 = vsel %vm97_vm0, %v100_v10, %v92_v7  ;;  %v102_v13 = vsel %vm98_vm1, %v100_v10, %v92_v7  ;;  %v105_v14 = vsel %vm97_vm0, %v104_v11, %v94_v8  ;;  %v106_v15 = vsel %vm98_vm1, %v104_v11, %v94_v8  ;;  %s652_s0 = sld [smem:[#allocation6 + $0x6]]  ;;  %s654_s2 = sld [smem:[#allocation2 + $0x7]] }
  0x48   :  { %v116_v18 = vstv %s602_s29  ;;  %v120_v19 = vstv %s604_s1  ;;  %vm109_vm2 = vcmp.ge.f32.partialorder %v612_v5, %v108_v16  ;;  %vm110_vm3 = vcmp.ge.f32.partialorder %v616_v6, %v108_v16  ;;  %s660_s14 = sld [smem:[#allocation4 + $0x7]]  ;;  %s672_s16 = sld [smem:[#allocation2 + $0x8]] }
  0x49   :  { %vm643_vm4 = vcmp.ge.f32.partialorder %v612_v5, %v120_v19  ;;  %vm648_vm5 = vcmp.ge.f32.partialorder %v616_v6, %v120_v19  ;;  %v113_v22 = vsel %vm109_vm2, %v112_v17, %v101_v12  ;;  %v114_v23 = vsel %vm110_vm3, %v112_v17, %v102_v13  ;;  %s662_s15 = sld [smem:[#allocation6 + $0x7]]  ;;  %s674_s17 = sld [smem:[#allocation4 + $0x8]] }
  0x4a   :  { %v117_v24 = vsel %vm109_vm2, %v116_v18, %v105_v14  ;;  %v118_v25 = vsel %vm110_vm3, %v116_v18, %v106_v15  ;;  %v124_v26 = vstv %s606_s5  ;;  %v128_v27 = vstv %s608_s3  ;;  %s680_s18 = sld [smem:[#allocation6 + $0x8]]  ;;  %s682_s19 = sld [smem:[#allocation2 + $0x9]] }
  0x4b   :  { %v132_v28 = vstv %s618_s30  ;;  %v136_v29 = vstv %s620_s7  ;;  %v125_v30 = vsel %vm643_vm4, %v124_v26, %v113_v22  ;;  %v126_v31 = vsel %vm648_vm5, %v124_v26, %v114_v23  ;;  %s688_s4 = sld [smem:[#allocation4 + $0x9]]  ;;  %s696_s21 = sld [smem:[#allocation2 + $0xa]] }
  0x4c   :  { %v129_v32 = vsel %vm643_vm4, %v128_v27, %v117_v24  ;;  %v130_v33 = vsel %vm648_vm5, %v128_v27, %v118_v25  ;;  %vm133_vm6 = vcmp.ge.f32.partialorder %v612_v5, %v132_v28  ;;  %vm134_vm7 = vcmp.ge.f32.partialorder %v616_v6, %v132_v28  ;;  %s690_s20 = sld [smem:[#allocation6 + $0x9]]  ;;  %s698_s22 = sld [smem:[#allocation4 + $0xa]] }
  0x4d   :  { %v140_v34 = vstv %s622_s8  ;;  %v144_v35 = vstv %s624_s9  ;;  %v137_v36 = vsel %vm133_vm6, %v136_v29, %v125_v30  ;;  %v138_v37 = vsel %vm134_vm7, %v136_v29, %v126_v31  ;;  %s712_s23 = sld [smem:[#allocation6 + $0xa]]  ;;  %s714_s24 = sld [smem:[#allocation2 + $0xb]] }
  0x4e   :  { %v141_v38 = vsel %vm133_vm6, %v140_v34, %v129_v32  ;;  %v142_v39 = vsel %vm134_vm7, %v140_v34, %v130_v33  ;;  %vm145_vm8 = vcmp.ge.f32.partialorder %v612_v5, %v144_v35  ;;  %vm146_vm9 = vcmp.ge.f32.partialorder %v616_v6, %v144_v35  ;;  %s720_s25 = sld [smem:[#allocation4 + $0xb]]  ;;  %s732_s27 = sld [smem:[#allocation2 + $0xc]] }
  0x4f   :  { %v148_v40 = vstv %s628_s10  ;;  %v152_v41 = vstv %s630_s11  ;;  %v156_v46 = vstv %s636_s12  ;;  %v160_v47 = vstv %s638_s13  ;;  %s722_s26 = sld [smem:[#allocation6 + $0xb]]  ;;  %s734_s28 = sld [smem:[#allocation4 + $0xc]] }
  0x50   :  { %v149_v42 = vsel %vm145_vm8, %v148_v40, %v137_v36  ;;  %v150_v43 = vsel %vm146_vm9, %v148_v40, %v138_v37  ;;  %v153_v44 = vsel %vm145_vm8, %v152_v41, %v141_v38  ;;  %v154_v45 = vsel %vm146_vm9, %v152_v41, %v142_v39  ;;  %s740_s29 = sld [smem:[#allocation6 + $0xc]]  ;;  %s742_s1 = sld [smem:[#allocation2 + $0xd]] }
  0x51   :  { %v164_v48 = vstv %s652_s0  ;;  %v168_v49 = vstv %s654_s2  ;;  %vm157_vm10 = vcmp.ge.f32.partialorder %v612_v5, %v156_v46  ;;  %vm158_vm11 = vcmp.ge.f32.partialorder %v616_v6, %v156_v46  ;;  %s748_s5 = sld [smem:[#allocation4 + $0xd]]  ;;  %s756_s30 = sld [smem:[#allocation2 + $0xe]] }
  0x52   :  { %vm703_vm12 = vcmp.ge.f32.partialorder %v612_v5, %v168_v49  ;;  %vm708_vm13 = vcmp.ge.f32.partialorder %v616_v6, %v168_v49  ;;  %v161_v52 = vsel %vm157_vm10, %v160_v47, %v149_v42  ;;  %v162_v53 = vsel %vm158_vm11, %v160_v47, %v150_v43  ;;  %s750_s3 = sld [smem:[#allocation6 + $0xd]]  ;;  %s758_s7 = sld [smem:[#allocation4 + $0xe]] }
  0x53   :  { %v165_v54 = vsel %vm157_vm10, %v164_v48, %v153_v44  ;;  %v166_v55 = vsel %vm158_vm11, %v164_v48, %v154_v45  ;;  %v172_v56 = vstv %s660_s14  ;;  %v176_v57 = vstv %s662_s15  ;;  %s764_s8 = sld [smem:[#allocation6 + $0xe]]  ;;  %s766_s9 = sld [smem:[#allocation2 + $0xf]] }
  0x54   :  { %v180_v58 = vstv %s672_s16  ;;  %v184_v59 = vstv %s674_s17  ;;  %v173_v60 = vsel %vm703_vm12, %v172_v56, %v161_v52  ;;  %v174_v61 = vsel %vm708_vm13, %v172_v56, %v162_v53  ;;  %s772_s10 = sld [smem:[#allocation4 + $0xf]]  ;;  %s776_s12 = sld [smem:[#allocation9]] }
  0x55   :  { %v177_v62 = vsel %vm703_vm12, %v176_v57, %v165_v54  ;;  %v178_v63 = vsel %vm708_vm13, %v176_v57, %v166_v55  ;;  %vm181_vm14 = vcmp.ge.f32.partialorder %v612_v5, %v180_v58  ;;  %vm182_vm15 = vcmp.ge.f32.partialorder %v616_v6, %v180_v58  ;;  %s774_s11 = sld [smem:[#allocation6 + $0xf]]  ;;  %s782_s13 = sld [smem:[#allocation7]] }
  0x56   :  { %v188_v4 = vstv %s680_s18  ;;  %v192_v7 = vstv %s682_s19  ;;  %v185_v8 = vsel %vm181_vm14, %v184_v59, %v173_v60  ;;  %v186_v9 = vsel %vm182_vm15, %v184_v59, %v174_v61  ;;  %s784_s0 = sld [smem:[#allocation7 + $0x1]]  ;;  %s790_s2 = sld [smem:[#allocation7 + $0x2]] }
  0x57   :  { %v189_v10 = vsel %vm181_vm14, %v188_v4, %v177_v62  ;;  %v190_v11 = vsel %vm182_vm15, %v188_v4, %v178_v63  ;;  %vm193_vm0 = vcmp.ge.f32.partialorder %v612_v5, %v192_v7  ;;  %vm194_vm1 = vcmp.ge.f32.partialorder %v616_v6, %v192_v7  ;;  %s792_s14 = sld [smem:[#allocation7 + $0x3]]  ;;  %s794_s15 = sld [smem:[#allocation7 + $0x4]] }
  0x58   :  { %v196_v12 = vstv %s688_s4  ;;  %v200_v13 = vstv %s690_s20  ;;  %v204_v18 = vstv %s696_s21  ;;  %v208_v19 = vstv %s698_s22  ;;  %s796_s16 = sld [smem:[#allocation7 + $0x5]]  ;;  %s802_s17 = sld [smem:[#allocation7 + $0x6]] }
  0x59   :  { %v197_v14 = vsel %vm193_vm0, %v196_v12, %v185_v8  ;;  %v198_v15 = vsel %vm194_vm1, %v196_v12, %v186_v9  ;;  %v201_v16 = vsel %vm193_vm0, %v200_v13, %v189_v10  ;;  %v202_v17 = vsel %vm194_vm1, %v200_v13, %v190_v11  ;;  %s804_s18 = sld [smem:[#allocation7 + $0x7]]  ;;  %s818_s19 = sld [smem:[#allocation7 + $0x8]] }
  0x5a   :  { %v212_v20 = vstv %s712_s23  ;;  %v216_v21 = vstv %s714_s24  ;;  %vm205_vm2 = vcmp.ge.f32.partialorder %v612_v5, %v204_v18  ;;  %vm206_vm3 = vcmp.ge.f32.partialorder %v616_v6, %v204_v18  ;;  %s820_s4 = sld [smem:[#allocation7 + $0x9]]  ;;  %s822_s20 = sld [smem:[#allocation7 + $0xa]] }
  0x5b   :  { %vm217_vm4 = vcmp.ge.f32.partialorder %v612_v5, %v216_v21  ;;  %vm218_vm5 = vcmp.ge.f32.partialorder %v616_v6, %v216_v21  ;;  %v209_v22 = vsel %vm205_vm2, %v208_v19, %v197_v14  ;;  %v210_v23 = vsel %vm206_vm3, %v208_v19, %v198_v15  ;;  %s824_s21 = sld [smem:[#allocation7 + $0xb]]  ;;  %s828_s22 = sld [smem:[#allocation7 + $0xc]] }
  0x5c   :  { %v213_v24 = vsel %vm205_vm2, %v212_v20, %v201_v16  ;;  %v214_v25 = vsel %vm206_vm3, %v212_v20, %v202_v17  ;;  %v220_v26 = vstv %s720_s25  ;;  %v224_v27 = vstv %s722_s26  ;;  %s830_s23 = sld [smem:[#allocation7 + $0xd]]  ;;  %s840_s24 = sld [smem:[#allocation7 + $0xe]] }
  0x5d   :  { %v228_v28 = vstv %s732_s27  ;;  %v232_v29 = vstv %s734_s28  ;;  %v221_v30 = vsel %vm217_vm4, %v220_v26, %v209_v22  ;;  %v222_v31 = vsel %vm218_vm5, %v220_v26, %v210_v23  ;;  %s842_s25 = sld [smem:[#allocation7 + $0xf]] }
  0x5e   :  { %v225_v32 = vsel %vm217_vm4, %v224_v27, %v213_v24  ;;  %v226_v33 = vsel %vm218_vm5, %v224_v27, %v214_v25  ;;  %vm229_vm6 = vcmp.ge.f32.partialorder %v612_v5, %v228_v28  ;;  %vm230_vm7 = vcmp.ge.f32.partialorder %v616_v6, %v228_v28 }
  0x5f   :  { %v236_v34 = vstv %s740_s29  ;;  %v240_v35 = vstv %s742_s1  ;;  %v233_v36 = vsel %vm229_vm6, %v232_v29, %v221_v30  ;;  %v234_v37 = vsel %vm230_vm7, %v232_v29, %v222_v31 }
  0x60   :  { %v237_v38 = vsel %vm229_vm6, %v236_v34, %v225_v32  ;;  %v238_v39 = vsel %vm230_vm7, %v236_v34, %v226_v33  ;;  %vm241_vm8 = vcmp.ge.f32.partialorder %v612_v5, %v240_v35  ;;  %vm242_vm9 = vcmp.ge.f32.partialorder %v616_v6, %v240_v35 }
  0x61   :  { %v244_v40 = vstv %s748_s5  ;;  %v248_v41 = vstv %s750_s3  ;;  %v252_v46 = vstv %s756_s30  ;;  %v256_v47 = vstv %s758_s7 }
  0x62   :  { %v245_v42 = vsel %vm241_vm8, %v244_v40, %v233_v36  ;;  %v246_v43 = vsel %vm242_vm9, %v244_v40, %v234_v37  ;;  %v249_v44 = vsel %vm241_vm8, %v248_v41, %v237_v38  ;;  %v250_v45 = vsel %vm242_vm9, %v248_v41, %v238_v39 }
  0x63   :  { %v260_v48 = vstv %s764_s8  ;;  %v264_v49 = vstv %s766_s9  ;;  %vm253_vm10 = vcmp.ge.f32.partialorder %v612_v5, %v252_v46  ;;  %vm254_vm11 = vcmp.ge.f32.partialorder %v616_v6, %v252_v46 }
  0x64   :  { %vm809_vm12 = vcmp.ge.f32.partialorder %v612_v5, %v264_v49  ;;  %vm814_vm13 = vcmp.ge.f32.partialorder %v616_v6, %v264_v49  ;;  %v257_v52 = vsel %vm253_vm10, %v256_v47, %v245_v42  ;;  %v258_v53 = vsel %vm254_vm11, %v256_v47, %v246_v43 }
  0x65   :  { %v261_v54 = vsel %vm253_vm10, %v260_v48, %v249_v44  ;;  %v262_v55 = vsel %vm254_vm11, %v260_v48, %v250_v45  ;;  %v268_v56 = vstv %s772_s10  ;;  %v272_v57 = vstv %s774_s11 }
  0x66   :  { %v269_v58 = vsel %vm809_vm12, %v268_v56, %v257_v52  ;;  %v270_v59 = vsel %vm814_vm13, %v268_v56, %v258_v53  ;;  %v273_v60 = vsel %vm809_vm12, %v272_v57, %v261_v54  ;;  %v274_v61 = vsel %vm814_vm13, %v272_v57, %v262_v55 }
  0x67   :  { %v275_v62 = vmul.f32 %v269_v58, %v612_v5  ;;  %v276_v63 = vmul.f32 %v270_v59, %v616_v6  ;;  %v847_v8 = vstv %s776_s12  ;;  %v284_v9 = vstv %s782_s13 }
  0x68   :  { %v288_v10 = vstv %s784_s0  ;;  %v294_v11 = vstv %s790_s2  ;;  %v300_v12 = vstv %s792_s14  ;;  %v306_v5 = vstv %s794_s15 }
  0x69   :  { %v277_v4 = vadd.f32 %v275_v62, %v273_v60  ;;  %v278_v7 = vadd.f32 %v276_v63, %v274_v61  ;;  %v312_v15 = vstv %s796_s16  ;;  %v318_v16 = vstv %s802_s17 }
  0x6a   :  { %v324_v6 = vstv %s804_s18  ;;  %v330_v17 = vstv %s818_s19  ;;  %v336_v18 = vstv %s820_s4  ;;  %v342_v21 = vstv %s822_s20 }
  0x6b   :  { %v279_v13 = vmul.f32 15.0, %v277_v4  ;;  %v280_v14 = vmul.f32 15.0, %v278_v7  ;;  %v348_v22 = vstv %s824_s21  ;;  %v354_v23 = vstv %s828_s22 }
  0x6c   :  { %v360_v24 = vstv %s830_s23  ;;  %v366_v25 = vstv %s840_s24  ;;  %v372_v26 = vstv %s842_s25  ;;  %vm886_vm12 = vcmp.lt.f32.partialorder %v86_v2, %v847_v8 }
  0x6d   :  { %v859_v19 = vround.rtne.f32 %v279_v13  ;;  %v861_v20 = vround.rtne.f32 %v280_v14  ;;  %vm893_vm13 = vcmp.lt.f32.partialorder %v87_v3, %v847_v8 }
  0x6f   :  { %vm285_vm14 = vcmp.ge.f32.partialorder %v859_v19, 1.0  ;;  %vm286_vm15 = vcmp.ge.f32.partialorder %v861_v20, 1.0  ;;  %vm291_vm0 = vcmp.ge.f32.partialorder %v859_v19, 2.0  ;;  %vm292_vm1 = vcmp.ge.f32.partialorder %v861_v20, 2.0 }
  0x70   :  { %v289_v27 = vsel %vm285_vm14, %v288_v10, %v284_v9  ;;  %v290_v28 = vsel %vm286_vm15, %v288_v10, %v284_v9  ;;  %vm297_vm2 = vcmp.ge.f32.partialorder %v859_v19, 3.0  ;;  %vm298_vm3 = vcmp.ge.f32.partialorder %v861_v20, 3.0 }
  0x71   :  { %v295_v29 = vsel %vm291_vm0, %v294_v11, %v289_v27  ;;  %v296_v30 = vsel %vm292_vm1, %v294_v11, %v290_v28  ;;  %vm303_vm4 = vcmp.ge.f32.partialorder %v859_v19, 4.0  ;;  %vm304_vm5 = vcmp.ge.f32.partialorder %v861_v20, 4.0 }
  0x72   :  { %v301_v31 = vsel %vm297_vm2, %v300_v12, %v295_v29  ;;  %v302_v32 = vsel %vm298_vm3, %v300_v12, %v296_v30  ;;  %vm309_vm6 = vcmp.ge.f32.partialorder %v859_v19, 5.0  ;;  %vm310_vm7 = vcmp.ge.f32.partialorder %v861_v20, 5.0 }
  0x73   :  { %v307_v33 = vsel %vm303_vm4, %v306_v5, %v301_v31  ;;  %v308_v34 = vsel %vm304_vm5, %v306_v5, %v302_v32  ;;  %vm315_vm8 = vcmp.ge.f32.partialorder %v859_v19, 6.0  ;;  %vm316_vm9 = vcmp.ge.f32.partialorder %v861_v20, 6.0 }
  0x74   :  { %v313_v35 = vsel %vm309_vm6, %v312_v15, %v307_v33  ;;  %v314_v36 = vsel %vm310_vm7, %v312_v15, %v308_v34  ;;  %vm321_vm10 = vcmp.ge.f32.partialorder %v859_v19, 7.0  ;;  %vm322_vm11 = vcmp.ge.f32.partialorder %v861_v20, 7.0 }
  0x75   :  { %v319_v39 = vsel %vm315_vm8, %v318_v16, %v313_v35  ;;  %v320_v40 = vsel %vm316_vm9, %v318_v16, %v314_v36  ;;  %vm327_vm14 = vcmp.ge.f32.partialorder %v859_v19, 8.0  ;;  %vm328_vm15 = vcmp.ge.f32.partialorder %v861_v20, 8.0 }
  0x76   :  { %v325_v41 = vsel %vm321_vm10, %v324_v6, %v319_v39  ;;  %v326_v42 = vsel %vm322_vm11, %v324_v6, %v320_v40  ;;  %vm333_vm0 = vcmp.ge.f32.partialorder %v859_v19, 9.0  ;;  %vm334_vm1 = vcmp.ge.f32.partialorder %v861_v20, 9.0 }
  0x77   :  { %v331_v2 = vsel %vm327_vm14, %v330_v17, %v325_v41  ;;  %v332_v43 = vsel %vm328_vm15, %v330_v17, %v326_v42  ;;  %vm339_vm2 = vcmp.ge.f32.partialorder %v859_v19, 10.0  ;;  %vm340_vm3 = vcmp.ge.f32.partialorder %v861_v20, 10.0 }
  0x78   :  { %v337_v3 = vsel %vm333_vm0, %v336_v18, %v331_v2  ;;  %v338_v44 = vsel %vm334_vm1, %v336_v18, %v332_v43  ;;  %vm345_vm4 = vcmp.ge.f32.partialorder %v859_v19, 11.0  ;;  %vm346_vm5 = vcmp.ge.f32.partialorder %v861_v20, 11.0 }
  0x79   :  { %v343_v45 = vsel %vm339_vm2, %v342_v21, %v337_v3  ;;  %v344_v46 = vsel %vm340_vm3, %v342_v21, %v338_v44  ;;  %vm351_vm6 = vcmp.ge.f32.partialorder %v859_v19, 12.0  ;;  %vm352_vm7 = vcmp.ge.f32.partialorder %v861_v20, 12.0 }
  0x7a   :  { %v349_v47 = vsel %vm345_vm4, %v348_v22, %v343_v45  ;;  %v350_v48 = vsel %vm346_vm5, %v348_v22, %v344_v46  ;;  %vm357_vm8 = vcmp.ge.f32.partialorder %v859_v19, 13.0  ;;  %vm358_vm9 = vcmp.ge.f32.partialorder %v861_v20, 13.0 }
  0x7b   :  { %v355_v49 = vsel %vm351_vm6, %v354_v23, %v349_v47  ;;  %v356_v50 = vsel %vm352_vm7, %v354_v23, %v350_v48  ;;  %vm363_vm10 = vcmp.ge.f32.partialorder %v859_v19, 14.0  ;;  %vm364_vm11 = vcmp.ge.f32.partialorder %v861_v20, 14.0 }
  0x7c   :  { %v361_v51 = vsel %vm357_vm8, %v360_v24, %v355_v49  ;;  %v362_v52 = vsel %vm358_vm9, %v360_v24, %v356_v50  ;;  %vm369_vm14 = vcmp.ge.f32.partialorder %v859_v19, 15.0  ;;  %vm370_vm15 = vcmp.ge.f32.partialorder %v861_v20, 15.0 }
  0x7d   :  { %v367_v53 = vsel %vm363_vm10, %v366_v25, %v361_v51  ;;  %v368_v54 = vsel %vm364_vm11, %v366_v25, %v362_v52  ;;  %vm382_vm0 = vcmp.lt.f32.partialorder %v589_v0, 0.0  ;;  %vm383_vm1 = vcmp.lt.f32.partialorder %v594_v1, 0.0 }
  0x7e   :  { %v373_v55 = vsel %vm369_vm14, %v372_v26, %v367_v53  ;;  %v374_v56 = vsel %vm370_vm15, %v372_v26, %v368_v54 }
  0x7f   :  { %v378_v57 = vsel %vm886_vm12, %v373_v55, 1.0  ;;  %v379_v58 = vsel %vm893_vm13, %v374_v56, 1.0 }
  0x80   :  { %v380_v59 = vmul.f32 %v378_v57, %v847_v8  ;;  %v381_v60 = vmul.f32 %v379_v58, %v847_v8 }
  0x82   :  { %v384_v61 = vsub.f32 0.0, %v380_v59  ;;  %v385_v62 = vsub.f32 0.0, %v381_v60 }
  0x84   :  { %v386_v63 = vsel %vm382_vm0, %v384_v61, %v380_v59  ;;  %v387_v4 = vsel %vm383_vm1, %v385_v62, %v381_v60 }
  0x85   :  { %388 = vst [vmem:[%s937_s6] sm:$0xff] %v386_v63  ;;  %389 = vst [vmem:[%s937_s6 + $0x8] sm:$0xff] %v387_v4 }
  0x86   :  { %394 = vsyncpa [#allocation3], 1 }
  0x87   :  { %395 = vsyncpa [#allocation5], 1 }
  0x88   :  { %396 = vsyncpa [#allocation8], 1 }

</bundles_post_ra>
